<compile_context>
chip_gen: v7x
topology: tpu7x:2x2x1
jax: 0.10.0
libtpu: 0.0.40
codegen_flags: <defaults>
</compile_context>

<pallas_src>
import functools

import jax
import jax.numpy as jnp
from jax.experimental import pallas as pl
from jax.experimental.pallas import tpu as pltpu


def _round_up(x, m):
    return ((x + m - 1) // m) * m


def _pow_gamma(base, gamma, gamma_int):
    """(1 - pt) ** gamma with integer-gamma specialization (VPU multiplies)."""
    if gamma_int is not None:            # static (trace-time) specialization
        if gamma_int == 0:
            return jnp.ones_like(base)
        w = base
        for _ in range(gamma_int - 1):    # gamma=2 -> x*x
            w = w * base
        return w
    return base ** jnp.float32(gamma)


def _focal_rows(logits_f32, tgt, alpha_row, *, gamma, gamma_int):
    """Per-row focal loss for one (TN, C) f32 tile -> (TN, 1)."""
    rows, c = logits_f32.shape

    # select-based "one-hot": boolean compare, no f32 materialize / multiplies
    class_ids = jax.lax.broadcasted_iota(jnp.int32, (rows, c), 1)
    sel = class_ids == tgt                                        # (TN, C) bool

    # cross_entropy(reduction='none') == logsumexp(logits) - logits[target]
    m = jnp.max(logits_f32, axis=-1, keepdims=True)
    lse = m + jnp.log(jnp.sum(jnp.exp(logits_f32 - m), axis=-1, keepdims=True))
    logit_t = jnp.sum(jnp.where(sel, logits_f32, 0.0), axis=-1, keepdims=True)
    ce = lse - logit_t                                            # (TN, 1)

    pt = jnp.exp(-ce)
    base = jnp.maximum(1.0 - pt, 0.0)                             # clamp rounding
    focal = _pow_gamma(base, gamma, gamma_int) * ce               # (TN, 1)

    if alpha_row is not None:                                     # alpha[target]
        alpha_t = jnp.sum(jnp.where(sel, alpha_row, 0.0), axis=-1, keepdims=True)
        focal = alpha_t * focal
    return focal


def _make_kernel(*, has_alpha, fused, gamma, gamma_int, n, tn):
    def kernel(*refs):
        if has_alpha:
            logits_ref, target_ref, alpha_ref, out_ref = refs
            alpha_row = alpha_ref[...].astype(jnp.float32)        # (1, C)
        else:
            logits_ref, target_ref, out_ref = refs
            alpha_row = None

        focal = _focal_rows(logits_ref[...].astype(jnp.float32),
                            target_ref[...], alpha_row,
                            gamma=gamma, gamma_int=gamma_int)      # (TN, 1)

        if fused:
            # Mask rows past the end of the batch (partial last tile) and emit
            # one per-tile partial sum, broadcast into a lane-dense (8,128)
            # slab so the output store is an unmasked full-block vst.
            rows = focal.shape[0]
            row_ids = (pl.program_id(0) * tn +
                       jax.lax.broadcasted_iota(jnp.int32, (rows, 1), 0))
            tile_sum = jnp.sum(jnp.where(row_ids < n, focal, 0.0))
            out_ref[...] = jnp.broadcast_to(tile_sum, out_ref.shape)
        else:
            # Per-row output; Pallas clips the store of the partial last tile.
            out_ref[...] = focal

    return kernel


def focal_loss(logits, targets, *, gamma=2.0, alpha=None, reduction="mean"):
    """Matches FocalLoss.forward: F.cross_entropy -> pt -> (1-pt)^gamma * ce."""
    n, c = logits.shape

    # ---- row tile from a ~4 MiB f32-tile VMEM budget (no row cap) -----------
    # Footprint ~= 2x input tile (double buffer) + ~4x f32 temporaries, which
    # stays under the 32 MiB scoped limit (and v7x's 64 MiB physical VMEM).
    budget_f32_tile = 4 * 1024 * 1024
    tn = budget_f32_tile // (c * 4)
    tn = max(8, (tn // 8) * 8)
    tn = min(tn, _round_up(n, 8))
    if n > 8:
        # v7x megacore: keep >= 2 tiles so the "parallel" axis can use both TCs.
        tn = min(tn, max(8, _round_up(-(-n // 2), 8)))
    num_tiles = -(-n // tn)                                        # partial last tile OK

    gamma_f = float(gamma)
    gamma_int = (int(gamma_f)
                 if (gamma_f.is_integer() and 0.0 <= gamma_f <= 16.0) else None)
    fused = reduction in ("mean", "sum")
    has_alpha = alpha is not None

    targets_2d = targets.astype(jnp.int32).reshape(n, 1)

    # ---- specs: class axis unpadded (block last dim == full dim) ------------
    in_specs = [
        pl.BlockSpec((tn, c), lambda i: (i, 0)),                   # logits tile
        pl.BlockSpec((tn, 1), lambda i: (i, 0)),                   # target tile
    ]
    operands = [logits, targets_2d]
    if has_alpha:
        alpha_vec = jnp.asarray(alpha, jnp.float32).reshape(1, c)
        in_specs.append(pl.BlockSpec((1, c), lambda i: (0, 0)))    # resident alpha
        operands.append(alpha_vec)

    if fused:
        out_shape = jax.ShapeDtypeStruct((num_tiles, 8, 128), jnp.float32)
        out_specs = pl.BlockSpec((1, 8, 128), lambda i: (i, 0, 0))
    else:
        out_shape = jax.ShapeDtypeStruct((n, 1), jnp.float32)
        out_specs = pl.BlockSpec((tn, 1), lambda i: (i, 0))

    kernel = _make_kernel(has_alpha=has_alpha, fused=fused, gamma=gamma_f,
                          gamma_int=gamma_int, n=n, tn=tn)

    out = pl.pallas_call(
        kernel,
        out_shape=out_shape,
        grid_spec=pltpu.PrefetchScalarGridSpec(
            num_scalar_prefetch=0,
            grid=(num_tiles,),
            in_specs=in_specs,
            out_specs=out_specs,
        ),
        compiler_params=pltpu.CompilerParams(
            dimension_semantics=("parallel",),      # batch tiles are independent
            vmem_limit_bytes=32 * 1024 * 1024,
        ),
    )(*operands)

    if fused:
        total = jnp.sum(out[:, 0, 0])               # per-tile partials
        if reduction == "mean":
            return total * (1.0 / n)                # single divide, once
        return total
    return out[:, 0]                                # reduction == 'none'


def _focal_loss_ref(logits, targets, gamma=2.0, alpha=None, reduction="mean"):
    """Pure-JAX reference mirroring the PyTorch forward."""
    logp = jax.nn.log_softmax(logits.astype(jnp.float32), axis=-1)
    ce = -jnp.take_along_axis(logp, targets[:, None].astype(jnp.int32),
                              axis=-1)[:, 0]
    pt = jnp.exp(-ce)
    focal = (1.0 - pt) ** gamma * ce
    if alpha is not None:
        focal = jnp.asarray(alpha, jnp.float32)[targets] * focal
    if reduction == "mean":
        return jnp.mean(focal)
    if reduction == "sum":
        return jnp.sum(focal)
    return focal


if __name__ == "__main__":
    key = jax.random.PRNGKey(0)
    k1, k2, k3, k4 = jax.random.split(key, 4)

    # Case 1: default module config (gamma=2, alpha=None, reduction='mean').
    N, C = 8, 32
    logits = jax.random.normal(k1, (N, C), dtype=jnp.float32)
    targets = jax.random.randint(k2, (N,), 0, C, dtype=jnp.int32)
    loss = jax.block_until_ready(focal_loss(logits, targets, gamma=2.0,
                                            alpha=None))
    ref = _focal_loss_ref(logits, targets, gamma=2.0, alpha=None)
    assert jnp.allclose(loss, ref, rtol=2e-5, atol=1e-6), (loss, ref)

    # Case 2: per-class alpha + ragged class axis (C=40) + partial row tile.
    N2, C2 = 50, 40
    logits2 = jax.random.normal(k3, (N2, C2), dtype=jnp.float32)
    targets2 = jax.random.randint(k4, (N2,), 0, C2, dtype=jnp.int32)
    alpha2 = jnp.linspace(0.25, 1.0, C2, dtype=jnp.float32)
    loss2 = jax.block_until_ready(focal_loss(logits2, targets2, gamma=2.0,
                                             alpha=alpha2))
    ref2 = _focal_loss_ref(logits2, targets2, gamma=2.0, alpha=alpha2)
    assert jnp.allclose(loss2, ref2, rtol=2e-5, atol=1e-6), (loss2, ref2)

    # Case 3: reduction='none' exercises the per-row output path (clipped
    # store on the partial last tile).
    per_row = jax.block_until_ready(focal_loss(logits2, targets2, gamma=2.0,
                                               alpha=alpha2, reduction="none"))
    ref_rows = _focal_loss_ref(logits2, targets2, gamma=2.0, alpha=alpha2,
                               reduction="none")
    assert per_row.shape == (N2,)
    assert jnp.allclose(per_row, ref_rows, rtol=2e-5, atol=1e-6)

    print("KERNEL_OK")
</pallas_src>

<mosaic_0001>
module attributes {stable_mosaic.version = 11 : i64} {
  func.func @kernel(%arg0: i32, %arg1: memref<8x32xf32, #tpu.memory_space<vmem>>, %arg2: memref<8x1xi32, #tpu.memory_space<vmem>>, %arg3: memref<1x8x128xf32, #tpu.memory_space<vmem>>) attributes {dimension_semantics = [#tpu.dimension_semantics<parallel>], iteration_bounds = array<i64: 1>, scalar_prefetch = 0 : i64, scratch_operands = 0 : i64, tpu.core_type = #tpu.core_type<tc>, window_params = [{transform_indices = @transform_0, window_bounds = array<i64: 8, 32>}, {transform_indices = @transform_1, window_bounds = array<i64: 8, 1>}, {transform_indices = @transform_2, window_bounds = array<i64: 1, 8, 128>}]} {
    %c0 = arith.constant 0 : index
    %c0_0 = arith.constant 0 : index
    %0 = vector.load %arg1[%c0, %c0_0] : memref<8x32xf32, #tpu.memory_space<vmem>>, vector<8x32xf32>
    %c0_1 = arith.constant 0 : index
    %c0_2 = arith.constant 0 : index
    %1 = vector.load %arg2[%c0_1, %c0_2] : memref<8x1xi32, #tpu.memory_space<vmem>>, vector<8x1xi32>
    %2 = tpu.iota {dimensions = array<i32: 1>} : vector<8x32xi32>
    %3 = vector.broadcast %1 : vector<8x1xi32> to vector<8x32xi32>
    %4 = arith.cmpi eq, %2, %3 : vector<8x32xi32>
    %cst = arith.constant dense<0xFF800000> : vector<8xf32>
    %5 = vector.multi_reduction <maximumf>, %0, %cst [1] : vector<8x32xf32> to vector<8xf32>
    %6 = vector.shape_cast %5 : vector<8xf32> to vector<8x1xf32>
    %7 = vector.broadcast %6 : vector<8x1xf32> to vector<8x32xf32>
    %8 = arith.subf %0, %7 : vector<8x32xf32>
    %9 = math.exp %8 : vector<8x32xf32>
    %cst_3 = arith.constant dense<0.000000e+00> : vector<8xf32>
    %10 = vector.multi_reduction <add>, %9, %cst_3 [1] : vector<8x32xf32> to vector<8xf32>
    %11 = vector.shape_cast %10 : vector<8xf32> to vector<8x1xf32>
    %12 = math.log %11 : vector<8x1xf32>
    %13 = arith.addf %6, %12 : vector<8x1xf32>
    %cst_4 = arith.constant 0.000000e+00 : f32
    %14 = vector.broadcast %cst_4 : f32 to vector<8x32xf32>
    %15 = arith.select %4, %0, %14 : vector<8x32xi1>, vector<8x32xf32>
    %cst_5 = arith.constant dense<0.000000e+00> : vector<8xf32>
    %16 = vector.multi_reduction <add>, %15, %cst_5 [1] : vector<8x32xf32> to vector<8xf32>
    %17 = vector.shape_cast %16 : vector<8xf32> to vector<8x1xf32>
    %18 = arith.subf %13, %17 : vector<8x1xf32>
    %cst_6 = arith.constant 0.000000e+00 : f32
    %19 = vector.broadcast %cst_6 : f32 to vector<8x1xf32>
    %20 = arith.subf %19, %18 : vector<8x1xf32>
    %21 = math.exp %20 : vector<8x1xf32>
    %cst_7 = arith.constant 1.000000e+00 : f32
    %22 = vector.broadcast %cst_7 : f32 to vector<8x1xf32>
    %23 = arith.subf %22, %21 : vector<8x1xf32>
    %cst_8 = arith.constant 0.000000e+00 : f32
    %24 = vector.broadcast %cst_8 : f32 to vector<8x1xf32>
    %25 = arith.maximumf %23, %24 : vector<8x1xf32>
    %26 = arith.mulf %25, %25 : vector<8x1xf32>
    %27 = arith.mulf %26, %18 : vector<8x1xf32>
    %c8_i32 = arith.constant 8 : i32
    %28 = arith.muli %arg0, %c8_i32 : i32
    %29 = tpu.iota {dimensions = array<i32: 0>} : vector<8x1xi32>
    %30 = vector.broadcast %28 : i32 to vector<8x1xi32>
    %31 = arith.addi %30, %29 : vector<8x1xi32>
    %c8_i32_9 = arith.constant 8 : i32
    %32 = vector.broadcast %c8_i32_9 : i32 to vector<8x1xi32>
    %33 = arith.cmpi slt, %31, %32 : vector<8x1xi32>
    %cst_10 = arith.constant 0.000000e+00 : f32
    %34 = vector.broadcast %cst_10 : f32 to vector<8x1xf32>
    %35 = arith.select %33, %27, %34 : vector<8x1xi1>, vector<8x1xf32>
    %36 = vector.shape_cast %35 : vector<8x1xf32> to vector<1x8x1xf32>
    %cst_11 = arith.constant dense<0.000000e+00> : vector<1xf32>
    %37 = vector.multi_reduction <add>, %36, %cst_11 [1, 2] : vector<1x8x1xf32> to vector<1xf32>
    %38 = vector.shape_cast %37 : vector<1xf32> to vector<1x1x1xf32>
    %39 = vector.extract %38[0, 0, 0] : f32 from vector<1x1x1xf32>
    %40 = vector.broadcast %39 : f32 to vector<1x8x128xf32>
    %c0_12 = arith.constant 0 : index
    %c0_13 = arith.constant 0 : index
    %c0_14 = arith.constant 0 : index
    %41 = vector.load %arg3[%c0_12, %c0_13, %c0_14] : memref<1x8x128xf32, #tpu.memory_space<vmem>>, vector<1x8x128xf32>
    tpu.vector_store %arg3[%c0_12, %c0_13, %c0_14], %40 {strides = array<i32>} : memref<1x8x128xf32, #tpu.memory_space<vmem>>, vector<1x8x128xf32>,
    return
  }
  func.func @transform_0(%arg0: i32) -> (i32, i32) {
    %c0_i32 = arith.constant 0 : i32
    %c0_i32_0 = arith.constant 0 : i32
    return %arg0, %c0_i32 : i32, i32
  }
  func.func @transform_1(%arg0: i32) -> (i32, i32) {
    %c0_i32 = arith.constant 0 : i32
    %c0_i32_0 = arith.constant 0 : i32
    return %arg0, %c0_i32 : i32, i32
  }
  func.func @transform_2(%arg0: i32) -> (i32, i32, i32) {
    %c0_i32 = arith.constant 0 : i32
    %c0_i32_0 = arith.constant 0 : i32
    %c0_i32_1 = arith.constant 0 : i32
    return %arg0, %c0_i32, %c0_i32_0 : i32, i32, i32
  }
}

</mosaic_0001>

<bundles_post_ra>
// kernel: tpu_custom_call.1
= control target key start
LH: loop header
LB: loop body
LE: loop exit
PB: predicated region body
PF: predicated region fallthrough
CT: control target
= control target key end

     0   :  { %vm20_vm0 = vcmask 261120   ;;  %s152_s0 = inlined_call_operand.vmem [shape: f32[8,32], index: 0, kind: input, shape index: {}]   ;;  %s153_s1 = inlined_call_operand.vmem [shape: s32[8,1], index: 1, kind: input, shape index: {}]   ;;  %s154_s2 = inlined_call_operand.hbm [shape: f32[1,8,128], index: 2, kind: output, shape index: {}]  }
   0x1   :  { %v12_v0 = vld [vmem:[%s152_s0] sm:$0xff] }
   0x2   :  { %7 = vsyncpa [#allocation3], 0  ;;  %v21_v1 = vsel %vm20_vm0, %v12_v0, -inf  ;;  %v114_v2 = vmov 0   ;;  %v13_v3 = vld [vmem:[%s153_s1] sm:$0xff]  ;;  %v14_v7 = vlaneseq  ;;  %vm52_vm2 = vcmask 7168  }
   0x3   :  { %83 = vset.pattern.permute.xlu0 %v114_v2  ;;  %s115_s0 = smov [#allocation2]  }
   0x4   :  { %22 = vmax.xlane.f32.xlu0 %v21_v1  ;;  %v15_v8 = vand.u32 127, %v14_v7  ;;  %s71_s1 = sshll.u32 %s115_s0, 4  ;;  %s72_s1 = int_to_ptr.vmem [resolvable:$true] %s71_s1 }
   0x5   :  { %s90_s14 = scalar_lea.vmem %s72_s1, 128  ;;  %p95_p1 = scmp.lt.s32.totalorder %s72_s1, %s72_s1 }
   0x6   :  { %p91_p0 = scmp.ne.s32.totalorder %s72_s1, %s90_s14  ;;  %p96_p2 = scmp.lt.s32.totalorder %s90_s14, %s90_s14 }
   0x8   :  { %p97_p3 = por %p96_p2, %p95_p1 }
   0xa   :  { %p98_p4 = pnand %p97_p3, %p91_p0 }
  0x1a   :  { %17 = vperm.xlu0 %83, %v13_v3  }
  0x91   :  { %v23_v4 = vpop.xlane.xlu0 %22 }
  0x92   :  { %v24_v5 = vsub.f32 %v12_v0, %v23_v4 }
  0x94   :  { %v25_v6 = vmul.f32 1.442695, %v24_v5 }
  0x96   :  { %84 = vpow2.f32 %v25_v6 }
  0x99   :  { %v18_v9 = vpop.permute.xlu0 %17 }
  0x9a   :  { %vm19_vm1 = vcmp.eq.s32.totalorder %v15_v8, %v18_v9 }
  0x9b   :  { %v33_v11 = vsel %vm19_vm1, %v12_v0, 0.0 }
  0x9c   :  { %v34_v13 = vsel %vm20_vm0, %v33_v11, 0.0 }
  0xa0   :  { %v85_v10 = vpop.eup %84 }
  0xa1   :  { %v27_v12 = vsel %vm20_vm0, %v85_v10, 0.0 }
  0xa2   :  { %28 = vadd.xlane.f32.xlu1 %v27_v12 }
  0xa6   :  { %35 = vadd.xlane.f32.xlu1 %v34_v13 }
 0x12f   :  { %v29_v14 = vpop.xlane.xlu1 %28 }
 0x130   :  { %86 = vlog2.f32 %v29_v14 }
 0x133   :  { %v36_v17 = vpop.xlane.xlu1 %35 }
 0x13a   :  { %v87_v15 = vpop.eup %86 }
 0x13b   :  { %v31_v16 = vmul.f32 0.6931472, %v87_v15 }
 0x13d   :  { %v32_v18 = vadd.f32 %v31_v16, %v23_v4 }
 0x13f   :  { %v37_v19 = vsub.f32 %v32_v18, %v36_v17 }
 0x141   :  { %v38_v20 = vsub.f32 0.0, %v37_v19 }
 0x143   :  { %v39_v21 = vmul.f32 1.442695, %v38_v20 }
 0x145   :  { %88 = vpow2.f32 %v39_v21 }
 0x14f   :  { %v89_v22 = vpop.eup %88 }
 0x150   :  { %v41_v23 = vsub.f32 1.0, %v89_v22 }
 0x152   :  { %v42_v24 = vmax.f32 %v41_v23, 0.0 }
 0x154   :  { %v43_v25 = vmul.f32 %v42_v24, %v42_v24 }
 0x156   :  { %v44_v26 = vmul.f32 %v43_v25, %v37_v19 }
 0x158   :  { %v53_v27 = vsel %vm52_vm2, %v44_v26, 0.0 }
 0x159   :  { %54 = vadd.xlane.f32.xlu1 %v53_v27 }
 0x1e6   :  { %v55_v28 = vpop.xlane.xlu1 %54 }
 0x1e7   :  { %v56_v29 = vrot.slane %v55_v28, 4 }
 0x1e9   :  { %v57_v30 = vadd.f32 %v56_v29, %v55_v28 }
 0x1eb   :  { %v58_v31 = vrot.slane %v57_v30, 2 }
 0x1ed   :  { %v59_v32 = vadd.f32 %v58_v31, %v57_v30 }
 0x1ef   :  { %v60_v33 = vrot.slane %v59_v32, 1 }
 0x1f1   :  { %v61_v34 = vadd.f32 %v60_v33, %v59_v32 }
 0x1f3   :  { %79 = vpush %v61_v34 }
 0x224   :  { %s80_s13 = spop %79 }
 0x225   :  { %v63_v35 = vstv %s80_s13 }
 0x226   :  { %64 = vst [vmem:[#allocation2] sm:$0xff] %v63_v35 }
 0x227   :  { %101 = shalt.err (!%p98_p4)
}
 0x228   :  { %s102_s17 = scalar_lea.hbm %s154_s2, 128 }
 0x229   :  { %p103_p5 = scmp.ne.s32.totalorder %s154_s2, %s102_s17  ;;  %p106_p6 = scmp.lt.u32.totalorder %s102_s17, %s154_s2 }
 0x22b   :  { %p108_p7 = pnand %p106_p6, %p103_p5 }
 0x22d   :  { %111 = shalt.err (!%p108_p7)
}
 0x22e   :  { %74 = dma.vmem_to_hbm [thread:$0]  %s72_s1, 128, %s154_s2, [#allocation3]  }
 0x22f   :  { %112 = dma.done.wait [#allocation3], 128  }
 0x230   :  { %113 = vsyncadd [#allocation3], 4294967168 }
 0x231   :  { %78 = vsyncpa [#allocation3], 1 }

</bundles_post_ra>
